<compile_context>
chip_gen: v7x
topology: tpu7x:2x2x1
jax: 0.10.0
libtpu: 0.0.40
codegen_flags: <defaults>
</compile_context>

<pallas_src>
import jax
import jax.numpy as jnp
from jax.experimental import pallas as pl
from jax.experimental.pallas import tpu as pltpu

F = 784  # 28 * 28


def _sigmoid(x):
    # Exactly sigmoid(x), but one EUP op (tanh) instead of exp + divide.
    return 0.5 * jnp.tanh(0.5 * x) + 0.5


def _ae_kernel(x_ref, w1_ref, b1_ref, w2_ref, b2_ref, o_ref):
    # x_ref : (tm, 784) f32   (batch tile, streamed)
    # w1_ref: (784, Hp) bf16  (resident across grid)
    # b1_ref: (1, Hp)   f32
    # w2_ref: (Hp, 784) bf16  (resident across grid)
    # b2_ref: (1, 784)  f32
    # o_ref : (tm, 784) bf16
    x = x_ref[...].astype(jnp.bfloat16)

    # linear1: bf16 MXU matmul, f32 accumulate; bias + sigmoid in f32.
    h = jnp.dot(x, w1_ref[...], preferred_element_type=jnp.float32) + b1_ref[...]
    h = _sigmoid(h)

    # TODO(synk): nn.Dropout(p=0.1) is identity in eval/inference mode; training-mode
    # stochastic masking (pltpu.prng_seed / prng_random_bits) intentionally omitted.

    # linear2: bf16 MXU matmul, f32 accumulate; bias + sigmoid in f32, bf16 store.
    y = jnp.dot(h.astype(jnp.bfloat16), w2_ref[...],
                preferred_element_type=jnp.float32) + b2_ref[...]
    y = _sigmoid(y)

    o_ref[...] = y.astype(o_ref.dtype)


def _round_up(x, m):
    return (x + m - 1) // m * m


def prepare_params(w1, b1, w2, b2):
    """One-time param prep: pad hidden dim to a multiple of 128 (lane-dense) and cast
    weights to bf16. Zero-padded hidden cols/rows keep the math exact
    (sigmoid(0 + 0) hidden cols are multiplied by zero rows of w2)."""
    H = w1.shape[1]
    Hp = max(128, _round_up(H, 128))
    w1_p = jnp.zeros((F, Hp), jnp.float32).at[:, :H].set(
        jnp.asarray(w1, jnp.float32)).astype(jnp.bfloat16)
    b1_p = jnp.zeros((1, Hp), jnp.float32).at[:, :H].set(
        jnp.asarray(b1, jnp.float32).reshape(1, H))
    w2_p = jnp.zeros((Hp, F), jnp.float32).at[:H, :].set(
        jnp.asarray(w2, jnp.float32)).astype(jnp.bfloat16)
    b2_p = jnp.asarray(b2, jnp.float32).reshape(1, F)
    return w1_p, b1_p, w2_p, b2_p


@jax.jit
def autoencoder_forward(x_img, w1_p, b1_p, w2_p, b2_p):
    """x_img: (B, 1, 28, 28) f32 -> (B, 1, 28, 28) bf16 reconstruction."""
    B = x_img.shape[0]
    Hp = w1_p.shape[1]
    x = x_img.reshape(B, F)  # free view; no pad/cast pass on the input

    # Batch tile: multiple of 8 (f32 sublane). Sized so the batch grid has >=2 steps
    # when B is large enough (shards across v7x's two TensorCores); tm=512 keeps the
    # double-buffered working set ~6 MiB — under v5e's 16 MiB scoped-VMEM default too.
    if B < 8:
        tm = B  # block dim equal to full array dim is legal
    else:
        tm = min(512, _round_up(pl.cdiv(B, 2), 8))
    grid = (pl.cdiv(B, tm),)  # uneven tail blocks handled by Pallas

    cost = pl.CostEstimate(
        flops=4 * B * F * Hp,                       # two matmuls
        transcendentals=B * (Hp + F),               # one tanh per activation element
        bytes_accessed=(B * F * 4                   # x in (f32)
                        + B * F * 2                 # out (bf16)
                        + 2 * F * Hp * 2            # weights (bf16, resident)
                        + (Hp + F) * 4),            # biases (f32)
    )

    out = pl.pallas_call(
        _ae_kernel,
        out_shape=jax.ShapeDtypeStruct((B, F), jnp.bfloat16),
        grid_spec=pltpu.PrefetchScalarGridSpec(
            num_scalar_prefetch=0,
            grid=grid,
            in_specs=[
                pl.BlockSpec((tm, F), lambda i: (i, 0)),    # x: tiled over batch
                pl.BlockSpec((F, Hp), lambda i: (0, 0)),    # w1: resident
                pl.BlockSpec((1, Hp), lambda i: (0, 0)),    # b1: resident
                pl.BlockSpec((Hp, F), lambda i: (0, 0)),    # w2: resident
                pl.BlockSpec((1, F), lambda i: (0, 0)),     # b2: resident
            ],
            out_specs=pl.BlockSpec((tm, F), lambda i: (i, 0)),
        ),
        compiler_params=pltpu.CompilerParams(
            # Batch tiles are independent -> megacore sharding on v7x; harmless on
            # single-TC v5e/v6e. HBM<->VMEM double-buffering comes from the BlockSpecs.
            dimension_semantics=("parallel",),
        ),
        cost_estimate=cost,
    )(x, w1_p, b1_p, w2_p, b2_p)

    return out.reshape(B, 1, 28, 28)  # Recons (free view)


def init_params(key, hidden):
    """Deterministic params matching nn.Linear(784, H) / nn.Linear(H, 784).

    PyTorch stores weight as (out, in); we store the transpose (in, out) so the kernel
    computes x @ W. Init mimics PyTorch's U(-1/sqrt(fan_in), 1/sqrt(fan_in))."""
    k1, k2, k3, k4 = jax.random.split(key, 4)
    bound1 = 1.0 / jnp.sqrt(784.0)
    bound2 = 1.0 / jnp.sqrt(float(hidden))
    w1 = jax.random.uniform(k1, (784, hidden), jnp.float32, -bound1, bound1)
    b1 = jax.random.uniform(k2, (1, hidden), jnp.float32, -bound1, bound1)
    w2 = jax.random.uniform(k3, (hidden, 784), jnp.float32, -bound2, bound2)
    b2 = jax.random.uniform(k4, (1, 784), jnp.float32, -bound2, bound2)
    return w1, b1, w2, b2


if __name__ == "__main__":
    key = jax.random.PRNGKey(0)
    k_x, k_p = jax.random.split(key)

    B, hidden = 2, 32
    x = jax.random.uniform(k_x, (B, 1, 28, 28), jnp.float32)  # MNIST-like input
    w1, b1, w2, b2 = init_params(k_p, hidden)
    params = prepare_params(w1, b1, w2, b2)  # one-time pad + bf16 cast

    out = autoencoder_forward(x, *params)
    out = jax.block_until_ready(out)

    # Reference in plain f32 JAX. Kernel uses bf16 matmuls + bf16 output, so the
    # tolerance is loosened accordingly (sigmoid outputs in (0,1) -> abs err << 2e-2).
    ref = jax.nn.sigmoid(
        jax.nn.sigmoid(x.reshape(B, 784) @ w1 + b1) @ w2 + b2
    ).reshape(B, 1, 28, 28)
    assert out.shape == (B, 1, 28, 28)
    assert out.dtype == jnp.bfloat16
    assert jnp.allclose(out.astype(jnp.float32), ref, atol=2e-2), "mismatch vs reference"

    print("KERNEL_OK")
</pallas_src>

<mosaic_0001>
module attributes {stable_mosaic.version = 11 : i64} {
  func.func @_ae_kernel(%arg0: i32, %arg1: memref<2x784xf32, #tpu.memory_space<vmem>>, %arg2: memref<784x128xbf16, #tpu.memory_space<vmem>>, %arg3: memref<1x128xf32, #tpu.memory_space<vmem>>, %arg4: memref<128x784xbf16, #tpu.memory_space<vmem>>, %arg5: memref<1x784xf32, #tpu.memory_space<vmem>>, %arg6: memref<2x784xbf16, #tpu.memory_space<vmem>>) attributes {dimension_semantics = [#tpu.dimension_semantics<parallel>], iteration_bounds = array<i64: 1>, scalar_prefetch = 0 : i64, scratch_operands = 0 : i64, tpu.core_type = #tpu.core_type<tc>, window_params = [{transform_indices = @transform_0, window_bounds = array<i64: 2, 784>}, {pipeline_mode = #tpu.pipeline_mode<synchronous>, transform_indices = @transform_1, window_bounds = array<i64: 784, 128>}, {pipeline_mode = #tpu.pipeline_mode<synchronous>, transform_indices = @transform_2, window_bounds = array<i64: 1, 128>}, {pipeline_mode = #tpu.pipeline_mode<synchronous>, transform_indices = @transform_3, window_bounds = array<i64: 128, 784>}, {pipeline_mode = #tpu.pipeline_mode<synchronous>, transform_indices = @transform_4, window_bounds = array<i64: 1, 784>}, {transform_indices = @transform_5, window_bounds = array<i64: 2, 784>}]} {
    %c0 = arith.constant 0 : index
    %c0_0 = arith.constant 0 : index
    %0 = vector.load %arg1[%c0, %c0_0] : memref<2x784xf32, #tpu.memory_space<vmem>>, vector<2x784xf32>
    %1 = arith.truncf %0 : vector<2x784xf32> to vector<2x784xbf16>
    %c0_1 = arith.constant 0 : index
    %c0_2 = arith.constant 0 : index
    %2 = vector.load %arg2[%c0_1, %c0_2] : memref<784x128xbf16, #tpu.memory_space<vmem>>, vector<784x128xbf16>
    %cst = arith.constant dense<0.000000e+00> : vector<2x128xf32>
    %3 = tpu.matmul %1, %2, %cst {dimension_numbers = #tpu.dot_dimension_numbers<[1], [0], [0], [1], [0, 0, 1, 1], [], []>} : vector<2x784xbf16>, vector<784x128xbf16>, vector<2x128xf32> -> vector<2x128xf32>
    %c0_3 = arith.constant 0 : index
    %c0_4 = arith.constant 0 : index
    %4 = vector.load %arg3[%c0_3, %c0_4] : memref<1x128xf32, #tpu.memory_space<vmem>>, vector<1x128xf32>
    %5 = vector.broadcast %4 : vector<1x128xf32> to vector<2x128xf32>
    %6 = arith.addf %3, %5 : vector<2x128xf32>
    %cst_5 = arith.constant 5.000000e-01 : f32
    %7 = vector.broadcast %cst_5 : f32 to vector<2x128xf32>
    %8 = arith.mulf %7, %6 : vector<2x128xf32>
    %9 = math.tanh %8 : vector<2x128xf32>
    %cst_6 = arith.constant 5.000000e-01 : f32
    %10 = vector.broadcast %cst_6 : f32 to vector<2x128xf32>
    %11 = arith.mulf %10, %9 : vector<2x128xf32>
    %cst_7 = arith.constant 5.000000e-01 : f32
    %12 = vector.broadcast %cst_7 : f32 to vector<2x128xf32>
    %13 = arith.addf %11, %12 : vector<2x128xf32>
    %14 = arith.truncf %13 : vector<2x128xf32> to vector<2x128xbf16>
    %c0_8 = arith.constant 0 : index
    %c0_9 = arith.constant 0 : index
    %15 = vector.load %arg4[%c0_8, %c0_9] : memref<128x784xbf16, #tpu.memory_space<vmem>>, vector<128x784xbf16>
    %cst_10 = arith.constant dense<0.000000e+00> : vector<2x784xf32>
    %16 = tpu.matmul %14, %15, %cst_10 {dimension_numbers = #tpu.dot_dimension_numbers<[1], [0], [0], [1], [0, 0, 1, 1], [], []>} : vector<2x128xbf16>, vector<128x784xbf16>, vector<2x784xf32> -> vector<2x784xf32>
    %c0_11 = arith.constant 0 : index
    %c0_12 = arith.constant 0 : index
    %17 = vector.load %arg5[%c0_11, %c0_12] : memref<1x784xf32, #tpu.memory_space<vmem>>, vector<1x784xf32>
    %18 = vector.broadcast %17 : vector<1x784xf32> to vector<2x784xf32>
    %19 = arith.addf %16, %18 : vector<2x784xf32>
    %cst_13 = arith.constant 5.000000e-01 : f32
    %20 = vector.broadcast %cst_13 : f32 to vector<2x784xf32>
    %21 = arith.mulf %20, %19 : vector<2x784xf32>
    %22 = math.tanh %21 : vector<2x784xf32>
    %cst_14 = arith.constant 5.000000e-01 : f32
    %23 = vector.broadcast %cst_14 : f32 to vector<2x784xf32>
    %24 = arith.mulf %23, %22 : vector<2x784xf32>
    %cst_15 = arith.constant 5.000000e-01 : f32
    %25 = vector.broadcast %cst_15 : f32 to vector<2x784xf32>
    %26 = arith.addf %24, %25 : vector<2x784xf32>
    %27 = arith.truncf %26 : vector<2x784xf32> to vector<2x784xbf16>
    %c0_16 = arith.constant 0 : index
    %c0_17 = arith.constant 0 : index
    %28 = vector.load %arg6[%c0_16, %c0_17] : memref<2x784xbf16, #tpu.memory_space<vmem>>, vector<2x784xbf16>
    tpu.vector_store %arg6[%c0_16, %c0_17], %27 {strides = array<i32>} : memref<2x784xbf16, #tpu.memory_space<vmem>>, vector<2x784xbf16>,
    return
  }
  func.func @transform_0(%arg0: i32) -> (i32, i32) {
    %c0_i32 = arith.constant 0 : i32
    %c0_i32_0 = arith.constant 0 : i32
    return %arg0, %c0_i32 : i32, i32
  }
  func.func @transform_1(%arg0: i32) -> (i32, i32) {
    %c0_i32 = arith.constant 0 : i32
    %c0_i32_0 = arith.constant 0 : i32
    %c0_i32_1 = arith.constant 0 : i32
    return %c0_i32, %c0_i32_0 : i32, i32
  }
  func.func @transform_2(%arg0: i32) -> (i32, i32) {
    %c0_i32 = arith.constant 0 : i32
    %c0_i32_0 = arith.constant 0 : i32
    %c0_i32_1 = arith.constant 0 : i32
    return %c0_i32, %c0_i32_0 : i32, i32
  }
  func.func @transform_3(%arg0: i32) -> (i32, i32) {
    %c0_i32 = arith.constant 0 : i32
    %c0_i32_0 = arith.constant 0 : i32
    %c0_i32_1 = arith.constant 0 : i32
    return %c0_i32, %c0_i32_0 : i32, i32
  }
  func.func @transform_4(%arg0: i32) -> (i32, i32) {
    %c0_i32 = arith.constant 0 : i32
    %c0_i32_0 = arith.constant 0 : i32
    %c0_i32_1 = arith.constant 0 : i32
    return %c0_i32, %c0_i32_0 : i32, i32
  }
  func.func @transform_5(%arg0: i32) -> (i32, i32) {
    %c0_i32 = arith.constant 0 : i32
    %c0_i32_0 = arith.constant 0 : i32
    return %arg0, %c0_i32 : i32, i32
  }
}

</mosaic_0001>

<bundles_post_ra>
// kernel: autoencoder_forward.1
= control target key start
LH: loop header
LB: loop body
LE: loop exit
PB: predicated region body
PF: predicated region fallthrough
CT: control target
= control target key end

     0   :  { %v1666_v21 = vmov 1983009808   ;;  %v29_v23 = vlaneseq  ;;  %v1667_v47 = vmov 0.0   ;;  %vm1668_vm0 = vmmov 0   ;;  %s2055_s1 = inlined_call_operand.vmem [shape: bf16[784,128], index: 1, kind: input, shape index: {}]   ;;  %s2056_s0 = inlined_call_operand.vmem [shape: f32[2,784], index: 0, kind: input, shape index: {}]   ;;  %s2057_s3 = inlined_call_operand.vmem [shape: bf16[128,784], index: 3, kind: input, shape index: {}]   ;;  %s2058_s2 = inlined_call_operand.vmem [shape: f32[1,128], index: 2, kind: input, shape index: {}]   ;;  %s2059_s4 = inlined_call_operand.vmem [shape: f32[1,784], index: 4, kind: input, shape index: {}]   ;;  %s2060_s5 = inlined_call_operand.vmem [shape: bf16[2,784], index: 5, kind: output, shape index: {}]  }
   0x1   :  { %v1519_v0 = vld [vmem:[%s2055_s1 + $0x40] sm:$0xff]   ;;  %v1523_v4 = vld [vmem:[%s2055_s1 + $0x48] sm:$0xff]   ;;  %v1527_v8 = vld [vmem:[%s2055_s1 + $0x50] sm:$0xff]   ;;  %v27_v22 = vunpack.c.l.s4 %v1666_v21  ;;  %vm471_vm1 = vcmask 130048   ;;  %vm1283_vm2 = vcmask 1040384   ;;  %vm1284_vm3 = vcmask 1041409  }
   0x2   :  { %v1520_v1 = vld [vmem:[%s2055_s1] sm:$0xff]   ;;  %1411 = vmatprep.subr.bf16.mxu0 %v1519_v0  ;;  %v1524_v5 = vld [vmem:[%s2055_s1 + $0x8] sm:$0xff]   ;;  %v1528_v9 = vld [vmem:[%s2055_s1 + $0x10] sm:$0xff]   ;;  %v1776_v29 = vshrl.u32 %v29_v23, 7  ;;  %vm1286_vm5 = vcmask 1042434   ;;  %vm1288_vm7 = vcmask 1043459  }
   0x3   :  { %v1521_v2 = vld [vmem:[%s2055_s1 + $0xc0] sm:$0xff]   ;;  %1412 = vmatpush3.bf16.msra.mxu0 %v1520_v1  ;;  %v1525_v6 = vld [vmem:[%s2055_s1 + $0xc8] sm:$0xff]   ;;  %v1529_v10 = vld [vmem:[%s2055_s1 + $0xd0] sm:$0xff]   ;;  %v28_v28 = vunpack.c.0.s8 %v27_v22  ;;  %vm1290_vm9 = vcmask 1044484   ;;  %vm1292_vm11 = vcmask 1045509   ;;  %vm1294_vm13 = vcmask 129030  }
   0x4   :  { %v1522_v3 = vld [vmem:[%s2055_s1 + $0x80] sm:$0xff]   ;;  %1433 = vmatprep.subr.bf16.mxu1 %v1521_v2  ;;  %1413 = vmatprep.subr.bf16.mxu0 %v1523_v4  ;;  %v1526_v7 = vld [vmem:[%s2055_s1 + $0x88] sm:$0xff]   ;;  %v1530_v11 = vld [vmem:[%s2055_s1 + $0x90] sm:$0xff]  }
   0x5   :  { %1434 = vmatpush3.bf16.msra.mxu1 %v1522_v3  ;;  %v1531_v12 = vld [vmem:[%s2055_s1 + $0x58] sm:$0xff]   ;;  %v1535_v16 = vld [vmem:[%s2055_s1 + $0x60] sm:$0xff]   ;;  %v1539_v20 = vld [vmem:[%s2055_s1 + $0x68] sm:$0xff]   ;;  %v31_v34 = vsub.s32 %v28_v28, %v1776_v29 }
   0x6   :  { %1435 = vmatprep.subr.bf16.mxu1 %v1525_v6  ;;  %v1532_v13 = vld [vmem:[%s2055_s1 + $0x18] sm:$0xff]   ;;  %v1536_v17 = vld [vmem:[%s2055_s1 + $0x20] sm:$0xff]   ;;  %v1540_v24 = vld [vmem:[%s2055_s1 + $0x28] sm:$0xff]  }
   0x7   :  { %1414 = vmatpush3.bf16.msra.mxu0 %v1524_v5  ;;  %v1533_v14 = vld [vmem:[%s2055_s1 + $0xd8] sm:$0xff]   ;;  %v1537_v18 = vld [vmem:[%s2055_s1 + $0xe0] sm:$0xff]   ;;  %v1541_v25 = vld [vmem:[%s2055_s1 + $0xe8] sm:$0xff]  }
   0x8   :  { %1415 = vmatprep.subr.bf16.mxu0 %v1527_v8  ;;  %v1534_v15 = vld [vmem:[%s2055_s1 + $0x98] sm:$0xff]   ;;  %v1538_v19 = vld [vmem:[%s2055_s1 + $0xa0] sm:$0xff]   ;;  %v1542_v26 = vld [vmem:[%s2055_s1 + $0xa8] sm:$0xff]  }
   0x9   :  { %1436 = vmatpush3.bf16.msra.mxu1 %v1526_v7  ;;  %v1543_v27 = vld [vmem:[%s2055_s1 + $0x70] sm:$0xff]   ;;  %v1547_v33 = vld [vmem:[%s2055_s1 + $0x78] sm:$0xff]   ;;  %v21_v37 = vld [vmem:[%s2056_s0] sm:$0xff] }
   0xa   :  { %1437 = vmatprep.subr.bf16.mxu1 %v1529_v10  ;;  %v1544_v30 = vld [vmem:[%s2055_s1 + $0x30] sm:$0xff]   ;;  %v1548_v35 = vld [vmem:[%s2055_s1 + $0x38] sm:$0xff]   ;;  %v22_v38 = vld [vmem:[%s2056_s0 + $0x8] sm:$0x3f]  ;;  %v32_v39 = vrot.slane %v21_v37, %v31_v34  ;;  %v25_v41 = vcombine.high %v21_v37, %v21_v37 }
   0xb   :  { %1416 = vmatpush3.bf16.msra.mxu0 %v1528_v9  ;;  %v1545_v31 = vld [vmem:[%s2055_s1 + $0xf0] sm:$0xff]   ;;  %v1549_v36 = vld [vmem:[%s2055_s1 + $0xf8] sm:$0xff]   ;;  %v49_v42 = vrot.slane %v22_v38, %v31_v34  ;;  %v1552_v43 = vld [vmem:[%s2055_s1 + $0x140] sm:$0xff]   ;;  %v42_v58 = vcombine.high %v22_v38, %v22_v38 }
   0xc   :  { %1417 = vmatprep.subr.bf16.mxu0 %v1531_v12  ;;  %v1546_v32 = vld [vmem:[%s2055_s1 + $0xb0] sm:$0xff]   ;;  %v1551_v40 = vld [vmem:[%s2055_s1 + $0xb8] sm:$0xff]   ;;  %v40_v44 = vcombine.high %v32_v39, %v32_v39  ;;  %v39_v45 = vrot.slane %v25_v41, %v31_v34  ;;  %v65_v46 = vpack.c.bf16 %v32_v39, %v32_v39  ;;  %v1554_v51 = vld [vmem:[%s2055_s1 + $0x100] sm:$0xff]  }
   0xd   :  { %1438 = vmatpush3.bf16.msra.mxu1 %v1530_v11  ;;  %v57_v48 = vcombine.high %v49_v42, %v49_v42  ;;  %v1555_v53 = vld [vmem:[%s2055_s1 + $0x148] sm:$0xff]   ;;  %v1557_v57 = vld [vmem:[%s2055_s1 + $0x150] sm:$0xff]   ;;  %v1559_v60 = vld [vmem:[%s2055_s1 + $0x158] sm:$0xff]   ;;  %v56_v61 = vrot.slane %v42_v58, %v31_v34  ;;  %v69_v9 = vpack.c.bf16 %v49_v42, %v49_v42 }
   0xe   :  { %1439 = vmatprep.subr.bf16.mxu1 %v1533_v14  ;;  %v66_v49 = vpack.c.bf16 %v40_v44, %v40_v44  ;;  %v41_v50 = vcombine.high %v39_v45, %v39_v45  ;;  %v67_v52 = vpack.c.bf16 %v39_v45, %v39_v45  ;;  %v1556_v56 = vld [vmem:[%s2055_s1 + $0x108] sm:$0xff]   ;;  %v1558_v59 = vld [vmem:[%s2055_s1 + $0x110] sm:$0xff]   ;;  %v1560_v62 = vld [vmem:[%s2055_s1 + $0x118] sm:$0xff]   ;;  %v1669_v44 = vmov 0  }
   0xf   :  { %1418 = vmatpush3.bf16.msra.mxu0 %v1532_v13  ;;  %v70_v55 = vpack.c.bf16 %v57_v48, %v57_v48  ;;  %v1561_v63 = vld [vmem:[%s2055_s1 + $0x160] sm:$0xff]   ;;  %v71_v1 = vpack.c.bf16 %v56_v61, %v56_v61  ;;  %v1563_v3 = vld [vmem:[%s2055_s1 + $0x168] sm:$0xff]   ;;  %v1565_v5 = vld [vmem:[%s2055_s1 + $0x170] sm:$0xff]  }
  0x10   :  { %1419 = vmatprep.subr.bf16.mxu0 %v1535_v16  ;;  %507 = vmatprep.mubr.bf16.mxu0 %v66_v49  ;;  %v68_v54 = vpack.c.bf16 %v41_v50, %v41_v50  ;;  %v1569_v0 = vld [vmem:[%s2055_s1 + $0x180] sm:$0xff]   ;;  %v1564_v4 = vld [vmem:[%s2055_s1 + $0x128] sm:$0xff]   ;;  %v1566_v6 = vld [vmem:[%s2055_s1 + $0x130] sm:$0xff]  }
  0x11   :  { %1440 = vmatpush3.bf16.msra.mxu1 %v1534_v15  ;;  %v1562_v2 = vld [vmem:[%s2055_s1 + $0x120] sm:$0xff]   ;;  %v1567_v7 = vld [vmem:[%s2055_s1 + $0x178] sm:$0xff]   ;;  %v1575_v13 = vld [vmem:[%s2057_s3 + $0xc] ss:$28 sps:$4 sm:$0xff]  }
  0x12   :  { %1441 = vmatprep.subr.bf16.mxu1 %v1537_v18  ;;  %547 = vmatprep.mubr.bf16.mxu1 %v68_v54  ;;  %v1568_v8 = vld [vmem:[%s2055_s1 + $0x138] sm:$0xff]   ;;  %v1572_v11 = vld [vmem:[%s2057_s3 + $0x4] ss:$28 sps:$4 sm:$0xff]   ;;  %v1584_v18 = vld [vmem:[%s2057_s3 + $0x74] ss:$28 sps:$4 sm:$0xff]  }
  0x13   :  { %1420 = vmatpush3.bf16.msra.mxu0 %v1536_v17  ;;  %v1570_v10 = vld [vmem:[%s2057_s3] ss:$28 sps:$4 sm:$0xff]   ;;  %v1573_v12 = vld [vmem:[%s2057_s3 + $0x8] ss:$28 sps:$4 sm:$0xff]   ;;  %v1576_v14 = vld [vmem:[%s2057_s3 + $0x38] ss:$28 sps:$4 sm:$0xff]  }
  0x14   :  { %1421 = vmatprep.subr.bf16.mxu0 %v1539_v20  ;;  %v1578_v15 = vld [vmem:[%s2057_s3 + $0x3c] ss:$28 sps:$4 sm:$0xff]   ;;  %v1581_v17 = vld [vmem:[%s2057_s3 + $0x44] ss:$28 sps:$4 sm:$0xff]   ;;  %v1582_v20 = vld [vmem:[%s2057_s3 + $0x70] ss:$28 sps:$4 sm:$0xff]  }
  0x15   :  { %1442 = vmatpush3.bf16.msra.mxu1 %v1538_v19  ;;  %v1579_v16 = vld [vmem:[%s2057_s3 + $0x40] ss:$28 sps:$4 sm:$0xff]   ;;  %v1585_v21 = vld [vmem:[%s2057_s3 + $0x78] ss:$28 sps:$4 sm:$0xff]   ;;  %v1590_v22 = vld [vmem:[%s2057_s3 + $0xac] ss:$28 sps:$4 sm:$0xff]  }
  0x16   :  { %1443 = vmatprep.subr.bf16.mxu1 %v1541_v25  ;;  %v1587_v19 = vld [vmem:[%s2057_s3 + $0x7c] ss:$28 sps:$4 sm:$0xff]   ;;  %v1593_v23 = vld [vmem:[%s2057_s3 + $0xb4] ss:$28 sps:$4 sm:$0xff]   ;;  %v1614_v39 = vld [vmem:[%s2057_s3 + $0x18c] ss:$28 sps:$4 sm:$0xff]  }
  0x17   :  { %1422 = vmatpush3.bf16.msra.mxu0 %v1540_v24  ;;  %v1588_v24 = vld [vmem:[%s2057_s3 + $0xa8] ss:$28 sps:$4 sm:$0xff]   ;;  %v1591_v25 = vld [vmem:[%s2057_s3 + $0xb0] ss:$28 sps:$4 sm:$0xff]   ;;  %v1594_v28 = vld [vmem:[%s2057_s3 + $0xe0] ss:$28 sps:$4 sm:$0xff]  }
  0x18   :  { %1423 = vmatprep.subr.bf16.mxu0 %v1543_v27  ;;  %v1599_v27 = vld [vmem:[%s2057_s3 + $0xec] ss:$28 sps:$4 sm:$0xff]   ;;  %v1603_v34 = vld [vmem:[%s2057_s3 + $0x120] ss:$28 sps:$4 sm:$0xff]   ;;  %v1609_v38 = vld [vmem:[%s2057_s3 + $0x158] ss:$28 sps:$4 sm:$0xff]  }
  0x19   :  { %1444 = vmatpush3.bf16.msra.mxu1 %v1542_v26  ;;  %v1596_v26 = vld [vmem:[%s2057_s3 + $0xe4] ss:$28 sps:$4 sm:$0xff]   ;;  %v1606_v37 = vld [vmem:[%s2057_s3 + $0x150] ss:$28 sps:$4 sm:$0xff]   ;;  %vm1285_vm4 = vmor %vm1284_vm3, %vm1283_vm2 }
  0x1a   :  { %1445 = vmatprep.subr.bf16.mxu1 %v1545_v31  ;;  %v1602_v31 = vld [vmem:[%s2057_s3 + $0x11c] ss:$28 sps:$4 sm:$0xff]   ;;  %v1612_v41 = vld [vmem:[%s2057_s3 + $0x188] ss:$28 sps:$4 sm:$0xff]   ;;  %v1615_v42 = vld [vmem:[%s2057_s3 + $0x190] ss:$28 sps:$4 sm:$0xff]  }
  0x1b   :  { %1424 = vmatpush3.bf16.msra.mxu0 %v1544_v30  ;;  %v1597_v30 = vld [vmem:[%s2057_s3 + $0xe8] ss:$28 sps:$4 sm:$0xff]   ;;  %vm1287_vm6 = vmor %vm1286_vm5, %vm1285_vm4 }
  0x1c   :  { %1425 = vmatprep.subr.bf16.mxu0 %v1547_v33  ;;  %v1600_v33 = vld [vmem:[%s2057_s3 + $0x118] ss:$28 sps:$4 sm:$0xff]   ;;  %vm1289_vm8 = vmor %vm1288_vm7, %vm1287_vm6 }
  0x1d   :  { %1446 = vmatpush3.bf16.msra.mxu1 %v1546_v32  ;;  %v1605_v32 = vld [vmem:[%s2057_s3 + $0x124] ss:$28 sps:$4 sm:$0xff]   ;;  %vm1291_vm10 = vmor %vm1290_vm9, %vm1289_vm8 }
  0x1e   :  { %1447 = vmatprep.subr.bf16.mxu1 %v1549_v36  ;;  %v1611_v36 = vld [vmem:[%s2057_s3 + $0x15c] ss:$28 sps:$4 sm:$0xff]   ;;  %vm1293_vm12 = vmor %vm1292_vm11, %vm1291_vm10 }
  0x1f   :  { %1426 = vmatpush3.bf16.msra.mxu0 %v1548_v35  ;;  %v1608_v35 = vld [vmem:[%s2057_s3 + $0x154] ss:$28 sps:$4 sm:$0xff]   ;;  %vm1295_vm14 = vmor %vm1294_vm13, %vm1293_vm12 }
  0x20   :  { %1455 = vmatprep.subr.bf16.mxu0 %v1552_v43  ;;  %v1620_v43 = vld [vmem:[%s2057_s3 + $0x14] ss:$28 sps:$4 sm:$0xff]  }
  0x21   :  { %1448 = vmatpush3.bf16.msra.mxu1 %v1551_v40  ;;  %v1617_v40 = vld [vmem:[%s2057_s3 + $0x194] ss:$28 sps:$4 sm:$0xff]  }
  0x22   :  { %1488 = vmatprep.subr.bf16.mxu1 %v1667_v47  ;;  %508 = vmatmul.mubr.bf16.vlgmr.msra.gmra.mrb[0].mxu0 %v65_v46  ;;  %v1301_v46 = vld [vmem:[%s2058_s2] ss:$0 sm:$0xff] }
  0x23   :  { %1456 = vmatpush3.bf16.msra.mxu0 %v1554_v51  ;;  %587 = vmatprep.mubr.bf16.mxu0 %v70_v55 }
  0x24   :  { %548 = vmatmul.mubr.bf16.vlgmr.msra.gmra.mrb[0].mxu1 %v67_v52  ;;  %1457 = vmatprep.subr.bf16.mxu0 %v1555_v53 }
  0x25   :  { %1490 = vmatprep.mubr.msk.bf16.mxu1 %vm1668_vm0, %v1667_v47  ;;  %1489 = vmatpush3.bf16.msra.mxu1 %v1569_v0 }
  0x26   :  { %1029 = vmatprep.subr.bf16.mxu1 %v1572_v11  ;;  %v1621_v11 = vld [vmem:[%s2057_s3 + $0x18] ss:$28 sps:$4 sm:$0xff]  }
  0x27   :  { %1458 = vmatpush3.bf16.msra.mxu0 %v1556_v56 }
  0x28   :  { %1459 = vmatprep.subr.bf16.mxu0 %v1557_v57 }
  0x2b   :  { %1460 = vmatpush3.bf16.msra.mxu0 %v1558_v59 }
  0x2c   :  { %1461 = vmatprep.subr.bf16.mxu0 %v1559_v60  ;;  %1491 = vmatmul.mubr.msk.bf16.vlgmr.msra.gmra.mrb[4].mxu1 %vm471_vm1, %v71_v1 }
  0x2d   :  { %1030 = vmatpush1.bf16.msra.mxu1 %v1570_v10  ;;  %1061 = vmatprep.mubr.bf16.mxu1 %v1669_v44  ;;  %v1618_v10 = vld [vmem:[%s2057_s3 + $0x10] ss:$28 sps:$4 sm:$0xff]  }
  0x2e   :  { %1031 = vmatprep.subr.bf16.mxu1 %v1578_v15  ;;  %v1625_v15 = vld [vmem:[%s2057_s3 + $0x50] ss:$28 sps:$4 sm:$0xff]  }
  0x2f   :  { %1462 = vmatpush3.bf16.msra.mxu0 %v1560_v62 }
  0x30   :  { %1463 = vmatprep.subr.bf16.mxu0 %v1561_v63 }
  0x31   :  { %1032 = vmatpush1.bf16.msra.mxu1 %v1576_v14  ;;  %v1622_v14 = vld [vmem:[%s2057_s3 + $0x48] ss:$28 sps:$4 sm:$0xff]  }
  0x32   :  { %1033 = vmatprep.subr.bf16.mxu1 %v1584_v18  ;;  %v1629_v18 = vld [vmem:[%s2057_s3 + $0x88] ss:$28 sps:$4 sm:$0xff]  }
  0x33   :  { %1464 = vmatpush3.bf16.msra.mxu0 %v1562_v2 }
  0x34   :  { %1465 = vmatprep.subr.bf16.mxu0 %v1563_v3 }
  0x35   :  { %1034 = vmatpush1.bf16.msra.mxu1 %v1582_v20  ;;  %v1630_v20 = vld [vmem:[%s2057_s3 + $0xb8] ss:$28 sps:$4 sm:$0xff]  }
  0x36   :  { %1035 = vmatprep.subr.bf16.mxu1 %v1590_v22  ;;  %v1636_v22 = vld [vmem:[%s2057_s3 + $0xf4] ss:$28 sps:$4 sm:$0xff]  }
  0x37   :  { %1466 = vmatpush3.bf16.msra.mxu0 %v1564_v4 }
  0x38   :  { %1467 = vmatprep.subr.bf16.mxu0 %v1565_v5 }
  0x39   :  { %1036 = vmatpush1.bf16.msra.mxu1 %v1588_v24  ;;  %v1637_v24 = vld [vmem:[%s2057_s3 + $0xf8] ss:$28 sps:$4 sm:$0xff]  }
  0x3a   :  { %1037 = vmatprep.subr.bf16.mxu1 %v1596_v26  ;;  %v1638_v26 = vld [vmem:[%s2057_s3 + $0x128] ss:$28 sps:$4 sm:$0xff]  }
  0x3b   :  { %1468 = vmatpush3.bf16.msra.mxu0 %v1566_v6 }
  0x3c   :  { %1469 = vmatprep.subr.bf16.mxu0 %v1567_v7 }
  0x3d   :  { %1038 = vmatpush1.bf16.msra.mxu1 %v1594_v28  ;;  %v1644_v28 = vld [vmem:[%s2057_s3 + $0x164] ss:$28 sps:$4 sm:$0xff]  }
  0x3e   :  { %1039 = vmatprep.subr.bf16.mxu1 %v1602_v31  ;;  %v1645_v31 = vld [vmem:[%s2057_s3 + $0x168] ss:$28 sps:$4 sm:$0xff]  }
  0x3f   :  { %1470 = vmatpush3.bf16.msra.mxu0 %v1568_v8 }
  0x40   :  { %1070 = vmatprep.subr.bf16.mxu0 %v1575_v13  ;;  %v1624_v13 = vld [vmem:[%s2057_s3 + $0x4c] ss:$28 sps:$4 sm:$0xff]  }
  0x41   :  { %1040 = vmatpush1.bf16.msra.mxu1 %v1600_v33  ;;  %v1646_v33 = vld [vmem:[%s2057_s3 + $0x198] ss:$28 sps:$4 sm:$0xff]  }
  0x42   :  { %588 = vmatmul.mubr.bf16.vlgmr.msra.gmra.mrb[4].mxu0 %v69_v9  ;;  %1041 = vmatprep.subr.bf16.mxu1 %v1608_v35  ;;  %v708_v35 = vsub.s32 0, %v1776_v29 }
  0x43   :  { %1071 = vmatpush1.bf16.msra.mxu0 %v1573_v12  ;;  %1102 = vmatprep.mubr.bf16.mxu0 %v1669_v44 }
  0x44   :  { %1072 = vmatprep.subr.bf16.mxu0 %v1581_v17  ;;  %v1626_v17 = vld [vmem:[%s2057_s3 + $0x80] ss:$28 sps:$4 sm:$0xff]  }
  0x45   :  { %1042 = vmatpush1.bf16.msra.mxu1 %v1606_v37  ;;  %v704_v37 = vld [vmem:[%s2059_s4] sm:$0x7f] }
  0x46   :  { %1043 = vmatprep.subr.bf16.mxu1 %v1614_v39  ;;  %v720_v39 = vsub.s32 3, %v1776_v29 }
  0x47   :  { %1073 = vmatpush1.bf16.msra.mxu0 %v1579_v16  ;;  %v1628_v16 = vld [vmem:[%s2057_s3 + $0x84] ss:$28 sps:$4 sm:$0xff]  }
  0x48   :  { %1074 = vmatprep.subr.bf16.mxu0 %v1587_v19  ;;  %v1632_v19 = vld [vmem:[%s2057_s3 + $0xbc] ss:$28 sps:$4 sm:$0xff]  }
  0x49   :  { %1044 = vmatpush1.bf16.msra.mxu1 %v1612_v41 }
  0x4a   :  { %1111 = vmatprep.subr.bf16.mxu1 %v1620_v43 }
  0x4b   :  { %1075 = vmatpush1.bf16.msra.mxu0 %v1585_v21  ;;  %v1633_v21 = vld [vmem:[%s2057_s3 + $0xc0] ss:$28 sps:$4 sm:$0xff]  }
  0x4c   :  { %1076 = vmatprep.subr.bf16.mxu0 %v1593_v23  ;;  %v1634_v23 = vld [vmem:[%s2057_s3 + $0xf0] ss:$28 sps:$4 sm:$0xff]  }
  0x4f   :  { %1077 = vmatpush1.bf16.msra.mxu0 %v1591_v25  ;;  %v1640_v25 = vld [vmem:[%s2057_s3 + $0x12c] ss:$28 sps:$4 sm:$0xff]  }
  0x50   :  { %1078 = vmatprep.subr.bf16.mxu0 %v1599_v27  ;;  %v1641_v27 = vld [vmem:[%s2057_s3 + $0x130] ss:$28 sps:$4 sm:$0xff]  }
  0x53   :  { %1079 = vmatpush1.bf16.msra.mxu0 %v1597_v30  ;;  %v1642_v30 = vld [vmem:[%s2057_s3 + $0x160] ss:$28 sps:$4 sm:$0xff]  }
  0x54   :  { %1080 = vmatprep.subr.bf16.mxu0 %v1605_v32  ;;  %v1648_v32 = vld [vmem:[%s2057_s3 + $0x19c] ss:$28 sps:$4 sm:$0xff]  }
  0x57   :  { %1081 = vmatpush1.bf16.msra.mxu0 %v1603_v34  ;;  %v1649_v34 = vld [vmem:[%s2057_s3 + $0x1a0] ss:$28 sps:$4 sm:$0xff]  }
  0x58   :  { %1082 = vmatprep.subr.bf16.mxu0 %v1611_v36  ;;  %v716_v36 = vsub.s32 2, %v1776_v29 }
  0x5a   :  { %v717_v41 = vrot.slane %v704_v37, %v716_v36 }
  0x5b   :  { %1083 = vmatpush1.bf16.msra.mxu0 %v1609_v38  ;;  %v712_v38 = vsub.s32 1, %v1776_v29 }
  0x5c   :  { %1084 = vmatprep.subr.bf16.mxu0 %v1617_v40  ;;  %v709_v40 = vrot.slane %v704_v37, %v708_v35 }
  0x5f   :  { %1085 = vmatpush1.bf16.msra.mxu0 %v1615_v42  ;;  %v713_v42 = vrot.slane %v704_v37, %v712_v38 }
  0x60   :  { %1494 = vmatprep.subr.bf16.mxu0 %v1667_v47 }
  0xf5   :  { %v1427_v45 = vpop.f32.mrb[0].mxu0 }
  0xf6   :  { %v1428_v48 = vpop.f32.mrb[1].mxu0 }
  0xf7   :  { %v1429_v49 = vadd.f32 %v1428_v48, %v1427_v45  ;;  %v1430_v50 = vpop.f32.mrb[2].mxu0  ;;  %v1449_v51 = vpop.f32.mrb[0].mxu1 }
  0xf8   :  { %v1431_v52 = vpop.f32.mrb[3].mxu0  ;;  %v1450_v53 = vpop.f32.mrb[1].mxu1 }
  0xf9   :  { %v510_v54 = vadd.f32 %v1429_v49, %v1301_v46  ;;  %v1451_v55 = vadd.f32 %v1450_v53, %v1449_v51  ;;  %v1452_v56 = vpop.f32.mrb[2].mxu1 }
  0xfa   :  { %v1453_v57 = vpop.f32.mrb[3].mxu1 }
  0xfb   :  { %v550_v58 = vadd.f32 %v1451_v55, %v510_v54 }
  0xff   :  { %v629_v59 = vpop.f32.mrb[4].mxu1 }
 0x100   :  { %v1492_v60 = vpop.f32.mrb[5].mxu1 }
 0x101   :  { %v632_v61 = vpop.f32.mrb[6].mxu1  ;;  %v1670_v60 = vmov 1966171168  }
 0x102   :  { %v1493_v62 = vpop.f32.mrb[7].mxu1  ;;  %v1238_v61 = vunpack.c.l.s4 %v1670_v60 }
 0x115   :  { %v1471_v63 = vpop.f32.mrb[4].mxu0 }
 0x116   :  { %v1472_v0 = vpop.f32.mrb[5].mxu0 }
 0x117   :  { %v1473_v1 = vadd.f32 %v1472_v0, %v1471_v63  ;;  %v1474_v2 = vpop.f32.mrb[6].mxu0 }
 0x118   :  { %v1475_v3 = vpop.f32.mrb[7].mxu0 }
 0x119   :  { %v590_v4 = vadd.f32 %v1473_v1, %v550_v58  ;;  %v1239_v1 = vunpack.c.0.s8 %v1238_v61 }
 0x11b   :  { %v630_v5 = vadd.f32 %v629_v59, %v590_v4 }
 0x11d   :  { %v635_v6 = vmul.f32 0.5, %v630_v5 }
 0x11f   :  { %1650 = vtanh.f32 %v635_v6 }
 0x129   :  { %v1651_v7 = vpop.eup %1650 }
 0x12a   :  { %v637_v8 = vmul.f32 0.5, %v1651_v7 }
 0x12c   :  { %v638_v9 = vadd.f32 0.5, %v637_v8 }
 0x12e   :  { %v639_v12 = vpack.c.bf16 %v638_v9, %v638_v9 }
 0x130   :  { %1062 = vmatmul.mubr.bf16.vlgmr.msra.gmra.mrb[8].mxu1 %v639_v12  ;;  %1103 = vmatmul.mubr.bf16.vlgmr.msra.gmra.mrb[8].mxu0 %v639_v12 }
 0x131   :  { %1112 = vmatpush1.bf16.msra.mxu1 %v1618_v10  ;;  %1495 = vmatpush3.bf16.msra.mxu0 %v1621_v11  ;;  %v1242_v10 = vsub.s32 %v1239_v1, %v1776_v29 }
 0x132   :  { %1113 = vmatprep.subr.bf16.mxu1 %v1624_v13  ;;  %1496 = vmatprep.subr.bf16.mxu0 %v1667_v47 }
 0x133   :  { %1143 = vmatprep.mubr.bf16.mxu1 %v1669_v44  ;;  %1510 = vmatprep.mubr.msk.bf16.mxu0 %vm1668_vm0, %v1667_v47 }
 0x135   :  { %1114 = vmatpush1.bf16.msra.mxu1 %v1622_v14  ;;  %1497 = vmatpush3.bf16.msra.mxu0 %v1625_v15 }
 0x136   :  { %1115 = vmatprep.subr.bf16.mxu1 %v1628_v16  ;;  %1498 = vmatprep.subr.bf16.mxu0 %v1667_v47  ;;  %v724_v16 = vsub.s32 4, %v1776_v29 }
 0x139   :  { %1116 = vmatpush1.bf16.msra.mxu1 %v1626_v17  ;;  %1499 = vmatpush3.bf16.msra.mxu0 %v1629_v18  ;;  %v732_v17 = vsub.s32 6, %v1776_v29  ;;  %v728_v18 = vsub.s32 5, %v1776_v29 }
 0x13a   :  { %1117 = vmatprep.subr.bf16.mxu1 %v1632_v19  ;;  %1500 = vmatprep.subr.bf16.mxu0 %v1667_v47 }
 0x13d   :  { %1118 = vmatpush1.bf16.msra.mxu1 %v1630_v20  ;;  %1501 = vmatpush3.bf16.msra.mxu0 %v1633_v21  ;;  %v725_v20 = vrot.slane %v704_v37, %v724_v16  ;;  %v733_v21 = vrot.slane %v704_v37, %v732_v17 }
 0x13e   :  { %1119 = vmatprep.subr.bf16.mxu1 %v1636_v22  ;;  %1502 = vmatprep.subr.bf16.mxu0 %v1667_v47  ;;  %v729_v22 = vrot.slane %v704_v37, %v728_v18 }
 0x141   :  { %1120 = vmatpush1.bf16.msra.mxu1 %v1634_v23  ;;  %1503 = vmatpush3.bf16.msra.mxu0 %v1637_v24 }
 0x142   :  { %1121 = vmatprep.subr.bf16.mxu1 %v1640_v25  ;;  %1504 = vmatprep.subr.bf16.mxu0 %v1667_v47 }
 0x145   :  { %1122 = vmatpush1.bf16.msra.mxu1 %v1638_v26  ;;  %1505 = vmatpush3.bf16.msra.mxu0 %v1641_v27 }
 0x146   :  { %1123 = vmatprep.subr.bf16.mxu1 %v1644_v28  ;;  %1506 = vmatprep.subr.bf16.mxu0 %v1667_v47 }
 0x149   :  { %1124 = vmatpush1.bf16.msra.mxu1 %v1642_v30  ;;  %1507 = vmatpush3.bf16.msra.mxu0 %v1645_v31 }
 0x14a   :  { %1125 = vmatprep.subr.bf16.mxu1 %v1648_v32  ;;  %1508 = vmatprep.subr.bf16.mxu0 %v1667_v47  ;;  %v721_v47 = vrot.slane %v704_v37, %v720_v39 }
 0x14d   :  { %1126 = vmatpush1.bf16.msra.mxu1 %v1646_v33  ;;  %1509 = vmatpush3.bf16.msra.mxu0 %v1649_v34 }
 0x150   :  { %1144 = vmatmul.mubr.bf16.vlgmr.msra.gmra.mrb[12].mxu1 %v639_v12  ;;  %1511 = vmatmul.mubr.bf16.vlgmr.msra.gmra.mrb[12].mxu0 %v639_v12 }
 0x203   :  { %v1063_v43 = vpop.f32.mrb[8].mxu1  ;;  %v1104_v44 = vpop.f32.mrb[8].mxu0 }
 0x204   :  { %v1064_v45 = vadd.f32 %v1063_v43, %v709_v40  ;;  %v1105_v46 = vadd.f32 %v1104_v44, %v717_v41  ;;  %v1065_v48 = vpop.f32.mrb[9].mxu1  ;;  %v1106_v49 = vpop.f32.mrb[9].mxu0 }
 0x205   :  { %v1066_v50 = vadd.f32 %v1065_v48, %v713_v42  ;;  %v1107_v51 = vadd.f32 %v1106_v49, %v721_v47  ;;  %v1067_v52 = vpop.f32.mrb[10].mxu1  ;;  %v1108_v53 = vpop.f32.mrb[10].mxu0 }
 0x206   :  { %v1192_v54 = vmul.f32 0.5, %v1064_v45  ;;  %v1194_v55 = vmul.f32 0.5, %v1105_v46  ;;  %v1068_v56 = vpop.f32.mrb[11].mxu1  ;;  %v1109_v57 = vpop.f32.mrb[11].mxu0 }
 0x207   :  { %v1193_v58 = vmul.f32 0.5, %v1066_v50  ;;  %v1195_v59 = vmul.f32 0.5, %v1107_v51 }
 0x208   :  { %1652 = vtanh.f32 %v1192_v54 }
 0x209   :  { %1654 = vtanh.f32 %v1194_v55 }
 0x20a   :  { %1656 = vtanh.f32 %v1193_v58 }
 0x20b   :  { %1658 = vtanh.f32 %v1195_v59 }
 0x212   :  { %v1653_v62 = vpop.eup %1652 }
 0x213   :  { %v1655_v63 = vpop.eup %1654  ;;  %v1206_v0 = vmul.f32 0.5, %v1653_v62 }
 0x214   :  { %v1657_v2 = vpop.eup %1656  ;;  %v1208_v3 = vmul.f32 0.5, %v1655_v63 }
 0x215   :  { %v1659_v4 = vpop.eup %1658  ;;  %v1213_v5 = vadd.f32 0.5, %v1206_v0  ;;  %v1207_v6 = vmul.f32 0.5, %v1657_v2 }
 0x216   :  { %v1215_v7 = vadd.f32 0.5, %v1208_v3  ;;  %v1209_v8 = vmul.f32 0.5, %v1659_v4 }
 0x217   :  { %v1214_v9 = vadd.f32 0.5, %v1207_v6 }
 0x218   :  { %v1216_v11 = vadd.f32 0.5, %v1209_v8 }
 0x219   :  { %v1408_v12 = vpack.c.bf16 %v1214_v9, %v1213_v5 }
 0x21a   :  { %v1409_v13 = vpack.c.bf16 %v1216_v11, %v1215_v7 }
 0x21b   :  { %v1243_v14 = vrot.slane %v1408_v12, %v1242_v10 }
 0x21c   :  { %v1250_v15 = vrot.slane %v1409_v13, %v1242_v10 }
 0x21e   :  { %v1265_v19 = vcombine.low %v1243_v14, %v1250_v15 }
 0x220   :  { %v1273_v51 = vrot.slane %v1265_v19, %v1242_v10 }
 0x223   :  { %v1145_v23 = vpop.f32.mrb[12].mxu1  ;;  %v1186_v24 = vpop.f32.mrb[12].mxu0 }
 0x224   :  { %v1146_v25 = vadd.f32 %v1145_v23, %v725_v20  ;;  %v1187_v26 = vadd.f32 %v1186_v24, %v733_v21  ;;  %v1147_v27 = vpop.f32.mrb[13].mxu1  ;;  %v1512_v28 = vpop.f32.mrb[13].mxu0 }
 0x225   :  { %v1148_v30 = vadd.f32 %v1147_v27, %v729_v22  ;;  %v1149_v31 = vpop.f32.mrb[14].mxu1  ;;  %v1189_v32 = vpop.f32.mrb[14].mxu0 }
 0x226   :  { %v1196_v33 = vmul.f32 0.5, %v1146_v25  ;;  %v1198_v34 = vmul.f32 0.5, %v1187_v26  ;;  %v1150_v35 = vpop.f32.mrb[15].mxu1  ;;  %v1513_v36 = vpop.f32.mrb[15].mxu0 }
 0x227   :  { %v1197_v38 = vmul.f32 0.5, %v1148_v30 }
 0x228   :  { %1660 = vtanh.f32 %v1196_v33 }
 0x229   :  { %1662 = vtanh.f32 %v1198_v34 }
 0x22a   :  { %1664 = vtanh.f32 %v1197_v38 }
 0x232   :  { %v1661_v29 = vpop.eup %1660 }
 0x233   :  { %v1663_v37 = vpop.eup %1662  ;;  %v1210_v39 = vmul.f32 0.5, %v1661_v29 }
 0x234   :  { %v1665_v40 = vpop.eup %1664  ;;  %v1212_v41 = vmul.f32 0.5, %v1663_v37 }
 0x235   :  { %v1217_v42 = vadd.f32 0.5, %v1210_v39  ;;  %v1211_v47 = vmul.f32 0.5, %v1665_v40 }
 0x236   :  { %v1219_v43 = vadd.f32 0.5, %v1212_v41 }
 0x237   :  { %v1218_v44 = vadd.f32 0.5, %v1211_v47 }
 0x238   :  { %v1226_v45 = vpack.c.bf16 %v1219_v43, %v1219_v43 }
 0x239   :  { %v1410_v46 = vpack.c.bf16 %v1218_v44, %v1217_v42 }
 0x23a   :  { %v1264_v48 = vrot.slane %v1226_v45, %v1242_v10 }
 0x23b   :  { %v1257_v49 = vrot.slane %v1410_v46, %v1242_v10 }
 0x23d   :  { %v1266_v50 = vcombine.low %v1257_v49, %v1264_v48 }
 0x23f   :  { %v1280_v52 = vrot.slane %v1266_v50, %v1242_v10 }
 0x241   :  { %v1281_v53 = vcombine.low %v1273_v51, %v1280_v52 }
 0x243   :  { %1296 = vst.msk [vmem:[%s2060_s5] sm:$0x7f] %vm1295_vm14, %v1281_v53 }

</bundles_post_ra>
